<compile_context>
chip_gen: v6e
topology: v6e:2x2x1
jax: 0.10.0
libtpu: 0.0.40
codegen_flags: <defaults>
</compile_context>

<pallas_src>
from functools import partial

import jax
import jax.numpy as jnp
from jax import lax
from jax.experimental import pallas as pl
from jax.experimental.pallas import tpu as pltpu


def qkv_kernel(rgb_ref, freq_ref,
               wq_ref, bq_ref, wkv_ref, bkv_ref, w4_ref, b4_ref,
               out_ref,
               q_sc, m_sc, l_sc, acc_sc,
               *, scale, matmul_dtype):
    """One (batch, q-tile, kv-tile) grid step of tiled attention.

    Layouts (all channels-on-sublanes, tokens-on-lanes):
      rgb_ref:  [1, C_in, tq]      freq_ref: [1, C_in, tk]
      wq_ref:   [C_hid, C_in]      bq_ref:   [C_hid, 1]
      wkv_ref:  [2*C_hid, C_in]    bkv_ref:  [2*C_hid, 1]
      w4_ref:   [C_out, C_hid]     b4_ref:   [C_out, 1]   (BN pre-folded)
      out_ref:  [1, C_out, tq]
      q_sc:     [C_hid, tq]   m_sc/l_sc: [1, tq]   acc_sc: [C_hid, tq]
    """
    ki = pl.program_id(2)
    nk = pl.num_programs(2)
    c_hid = q_sc.shape[0]

    # ---- init: q projection (scale folded in) + online-softmax state -------
    @pl.when(ki == 0)
    def _init():
        rgb_t = rgb_ref[0]                                        # [C_in, tq]
        q = jnp.dot(wq_ref[...], rgb_t,
                    preferred_element_type=jnp.float32)            # [C_hid, tq]
        q_sc[...] = (q + bq_ref[...]) * scale
        m_sc[...] = jnp.full_like(m_sc, -jnp.inf)
        l_sc[...] = jnp.zeros_like(l_sc)
        acc_sc[...] = jnp.zeros_like(acc_sc)

    # ---- fused k/v projection for this kv tile ------------------------------
    freq_t = freq_ref[0]                                           # [C_in, tk]
    kv = jnp.dot(wkv_ref[...], freq_t,
                 preferred_element_type=jnp.float32) + bkv_ref[...]  # [2*C_hid, tk]
    k_t = kv[:c_hid]                                               # [C_hid, tk]
    v_t = kv[c_hid:]                                               # [C_hid, tk]

    # ---- scores: contract channel (sublane) dims, no explicit transpose ----
    q = q_sc[...]
    s = lax.dot_general(k_t.astype(matmul_dtype), q.astype(matmul_dtype),
                        (((0,), (0,)), ((), ())),
                        preferred_element_type=jnp.float32)        # [tk, tq]

    # ---- online softmax over the kv (sublane) axis --------------------------
    m_prev = m_sc[...]                                             # [1, tq]
    m_new = jnp.maximum(m_prev, jnp.max(s, axis=0, keepdims=True))
    alpha = jnp.exp(m_prev - m_new)                                # [1, tq]
    p = jnp.exp(s - m_new)                                         # [tk, tq]
    l_sc[...] = alpha * l_sc[...] + jnp.sum(p, axis=0, keepdims=True)
    pv = lax.dot_general(v_t.astype(matmul_dtype), p.astype(matmul_dtype),
                         (((1,), (0,)), ((), ())),
                         preferred_element_type=jnp.float32)       # [C_hid, tq]
    acc_sc[...] = alpha * acc_sc[...] + pv
    m_sc[...] = m_new

    # ---- finalize: normalize, conv4(+folded BN), LeakyReLU, residual -------
    @pl.when(ki == nk - 1)
    def _finalize():
        z = acc_sc[...] * pl.reciprocal(l_sc[...], approx=True)    # [C_hid, tq]
        y = jnp.dot(w4_ref[...], z,
                    preferred_element_type=jnp.float32) + b4_ref[...]  # [C_out, tq]
        y = jnp.where(y >= 0, y, 0.2 * y)                          # LeakyReLU(0.2)
        out_ref[0] = (rgb_ref[0] + y).astype(out_ref.dtype)


def qkv_block_forward(rgb, freq, params, *, tile_q=None, tile_kv=None,
                      matmul_dtype=jnp.float32):
    """rgb, freq: [B, C_in, H, W] (NCHW, like PyTorch). Returns [B, C_out, H, W].

    Set matmul_dtype=jnp.bfloat16 on v6e/v7x for full-rate MXU on the two
    token-scale matmuls (f32 accumulation is kept via preferred_element_type).
    """
    B, C_in, H, W = rgb.shape
    N = H * W
    C_hid = params["wq"].shape[1]
    C_out = params["w4"].shape[1]
    assert C_out == C_in, "residual `rgb + conv4(z)` requires out_channel == in_channel"
    scale = float(C_hid) ** (-0.5)

    # NCHW -> [B, C, N]: pure reshape, no HBM transpose. Tokens land on lanes.
    rgb_f = rgb.reshape(B, C_in, N).astype(jnp.float32)
    freq_f = freq.reshape(B, C_in, N).astype(jnp.float32)

    def _pick_tile(n):
        for t in (256, 128):            # 256-aligned fills the v6e/v7x MXU; 128 for v5e
            if n % t == 0:
                return t
        return n                        # small inputs: one full-extent tile
    tq = tile_q or _pick_tile(N)
    tk = tile_kv or _pick_tile(N)
    # TODO(synk): ragged N would need padding/masking of the last q/kv tile.
    assert N % tq == 0 and N % tk == 0, "N = H*W must be divisible by the tile sizes"
    nq, nk = N // tq, N // tk

    # Pre-transposed weights (channels-first kernel layout), fused Wk|Wv,
    # and eval-mode BatchNorm folded into conv4.
    wq_t = params["wq"].T                                             # [C_hid, C_in]
    bq = params["bq"].reshape(C_hid, 1)
    wkv_t = jnp.concatenate([params["wk"], params["wv"]], axis=1).T   # [2*C_hid, C_in]
    bkv = jnp.concatenate([params["bk"], params["bv"]], axis=0).reshape(2 * C_hid, 1)
    w4_t = (params["w4"] * params["bn_scale"][None, :]).T             # [C_out, C_hid]
    b4 = (params["b4"] * params["bn_scale"] + params["bn_shift"]).reshape(C_out, 1)

    kernel = partial(qkv_kernel, scale=scale, matmul_dtype=matmul_dtype)

    out_flat = pl.pallas_call(
        kernel,
        out_shape=jax.ShapeDtypeStruct((B, C_out, N), jnp.float32),
        grid_spec=pltpu.PrefetchScalarGridSpec(
            num_scalar_prefetch=0,
            grid=(B, nq, nk),
            in_specs=[
                pl.BlockSpec((1, C_in, tq), lambda b, qi, ki: (b, 0, qi)),   # rgb q-tile
                pl.BlockSpec((1, C_in, tk), lambda b, qi, ki: (b, 0, ki)),   # freq kv-tile
                pl.BlockSpec((C_hid, C_in), lambda b, qi, ki: (0, 0)),       # Wq^T
                pl.BlockSpec((C_hid, 1), lambda b, qi, ki: (0, 0)),          # bq
                pl.BlockSpec((2 * C_hid, C_in), lambda b, qi, ki: (0, 0)),   # [Wk|Wv]^T
                pl.BlockSpec((2 * C_hid, 1), lambda b, qi, ki: (0, 0)),      # [bk|bv]
                pl.BlockSpec((C_out, C_hid), lambda b, qi, ki: (0, 0)),      # W4^T (BN folded)
                pl.BlockSpec((C_out, 1), lambda b, qi, ki: (0, 0)),          # b4  (BN folded)
            ],
            out_specs=pl.BlockSpec((1, C_out, tq), lambda b, qi, ki: (b, 0, qi)),
            scratch_shapes=[
                pltpu.VMEM((C_hid, tq), jnp.float32),   # q tile (scale folded in)
                pltpu.VMEM((1, tq), jnp.float32),       # running max
                pltpu.VMEM((1, tq), jnp.float32),       # running sum
                pltpu.VMEM((C_hid, tq), jnp.float32),   # output accumulator z^T
            ]),
        compiler_params=pltpu.CompilerParams(
            dimension_semantics=("parallel", "parallel", "arbitrary"),
            vmem_limit_bytes=32 * 1024 * 1024),
    )(rgb_f, freq_f, wq_t, bq, wkv_t, bkv, w4_t, b4)

    return out_flat.reshape(B, C_out, H, W)


def init_params(key, c_in, c_hid, c_out):
    ks = jax.random.split(key, 8)
    p = {
        "wq": 0.1 * jax.random.normal(ks[0], (c_in, c_hid), jnp.float32),
        "bq": 0.1 * jax.random.normal(ks[1], (c_hid,), jnp.float32),
        "wk": 0.1 * jax.random.normal(ks[2], (c_in, c_hid), jnp.float32),
        "bk": 0.1 * jax.random.normal(ks[3], (c_hid,), jnp.float32),
        "wv": 0.1 * jax.random.normal(ks[4], (c_in, c_hid), jnp.float32),
        "bv": 0.1 * jax.random.normal(ks[5], (c_hid,), jnp.float32),
        "w4": 0.1 * jax.random.normal(ks[6], (c_hid, c_out), jnp.float32),
        "b4": 0.1 * jax.random.normal(ks[7], (c_out,), jnp.float32),
    }
    # BatchNorm2d (eval) folded: gamma=1, beta=0, running_mean=0, running_var=1
    gamma = jnp.ones((c_out,), jnp.float32)
    beta = jnp.zeros((c_out,), jnp.float32)
    rmean = jnp.zeros((c_out,), jnp.float32)
    rvar = jnp.ones((c_out,), jnp.float32)
    eps = 1e-5
    p["bn_scale"] = gamma / jnp.sqrt(rvar + eps)
    p["bn_shift"] = beta - rmean * p["bn_scale"]
    return p


def reference_forward(rgb, freq, params):
    """Pure-JAX reference mirroring the PyTorch forward (eval-mode BN)."""
    B, C_in, H, W = rgb.shape
    N = H * W
    C_hid = params["wq"].shape[1]
    scale = float(C_hid) ** (-0.5)
    rgb_t = jnp.transpose(rgb.reshape(B, C_in, N), (0, 2, 1))    # [B, N, C_in]
    freq_t = jnp.transpose(freq.reshape(B, C_in, N), (0, 2, 1))
    q = rgb_t @ params["wq"] + params["bq"]
    k = freq_t @ params["wk"] + params["bk"]
    v = freq_t @ params["wv"] + params["bv"]
    attn = jnp.einsum("bnc,bmc->bnm", q, k) * scale
    m = jax.nn.softmax(attn, axis=-1)
    z = jnp.einsum("bnm,bmc->bnc", m, v)
    y = z @ params["w4"] + params["b4"]
    y = y * params["bn_scale"] + params["bn_shift"]
    y = jnp.where(y >= 0, y, 0.2 * y)
    out = rgb_t + y
    return jnp.transpose(out, (0, 2, 1)).reshape(B, -1, H, W)


if __name__ == "__main__":
    # out_channel == in_channel is required by the residual add in the module.
    B, C_in, C_hid, C_out, H, W = 2, 4, 8, 4, 16, 16       # N = 256 tokens
    key = jax.random.PRNGKey(0)
    k_rgb, k_freq, k_params = jax.random.split(key, 3)

    rgb = jax.random.normal(k_rgb, (B, C_in, H, W), jnp.float32)
    freq = jax.random.normal(k_freq, (B, C_in, H, W), jnp.float32)
    params = init_params(k_params, C_in, C_hid, C_out)

    # tile 128 -> 2 q-tiles x 2 kv-tiles: exercises the online-softmax path.
    out = qkv_block_forward(rgb, freq, params, tile_q=128, tile_kv=128)
    out = jax.block_until_ready(out)

    ref = jax.block_until_ready(reference_forward(rgb, freq, params))
    assert out.shape == (B, C_out, H, W)
    err = float(jnp.max(jnp.abs(out - ref)))
    # tolerance accounts for pl.reciprocal(approx=True) in the softmax normalization
    assert err < 2e-3, f"mismatch vs JAX reference: {err}"

    print("KERNEL_OK")
</pallas_src>

<mosaic_0001>
module attributes {stable_mosaic.version = 11 : i64} {
  func.func @qkv_kernel(%arg0: i32, %arg1: i32, %arg2: i32, %arg3: memref<1x4x128xf32, #tpu.memory_space<vmem>>, %arg4: memref<1x4x128xf32, #tpu.memory_space<vmem>>, %arg5: memref<8x4xf32, #tpu.memory_space<vmem>>, %arg6: memref<8x1xf32, #tpu.memory_space<vmem>>, %arg7: memref<16x4xf32, #tpu.memory_space<vmem>>, %arg8: memref<16x1xf32, #tpu.memory_space<vmem>>, %arg9: memref<4x8xf32, #tpu.memory_space<vmem>>, %arg10: memref<4x1xf32, #tpu.memory_space<vmem>>, %arg11: memref<1x4x128xf32, #tpu.memory_space<vmem>>, %arg12: memref<8x128xf32, #tpu.memory_space<vmem>>, %arg13: memref<1x128xf32, #tpu.memory_space<vmem>>, %arg14: memref<1x128xf32, #tpu.memory_space<vmem>>, %arg15: memref<8x128xf32, #tpu.memory_space<vmem>>) attributes {dimension_semantics = [#tpu.dimension_semantics<parallel>, #tpu.dimension_semantics<parallel>, #tpu.dimension_semantics<arbitrary>], iteration_bounds = array<i64: 2, 2, 2>, scalar_prefetch = 0 : i64, scratch_operands = 4 : i64, tpu.core_type = #tpu.core_type<tc>, window_params = [{transform_indices = @transform_0, window_bounds = array<i64: 1, 4, 128>}, {transform_indices = @transform_1, window_bounds = array<i64: 1, 4, 128>}, {pipeline_mode = #tpu.pipeline_mode<synchronous>, transform_indices = @transform_2, window_bounds = array<i64: 8, 4>}, {pipeline_mode = #tpu.pipeline_mode<synchronous>, transform_indices = @transform_3, window_bounds = array<i64: 8, 1>}, {pipeline_mode = #tpu.pipeline_mode<synchronous>, transform_indices = @transform_4, window_bounds = array<i64: 16, 4>}, {pipeline_mode = #tpu.pipeline_mode<synchronous>, transform_indices = @transform_5, window_bounds = array<i64: 16, 1>}, {pipeline_mode = #tpu.pipeline_mode<synchronous>, transform_indices = @transform_6, window_bounds = array<i64: 4, 8>}, {pipeline_mode = #tpu.pipeline_mode<synchronous>, transform_indices = @transform_7, window_bounds = array<i64: 4, 1>}, {transform_indices = @transform_8, window_bounds = array<i64: 1, 4, 128>}]} {
    %c0_i32 = arith.constant 0 : i32
    %0 = arith.cmpi eq, %arg2, %c0_i32 : i32
    %1 = arith.extui %0 : i1 to i32
    %c0_i32_0 = arith.constant 0 : i32
    %2 = arith.cmpi ne, %1, %c0_i32_0 : i32
    scf.if %2 {
      %c0_26 = arith.constant 0 : index
      %c0_27 = arith.constant 0 : index
      %c0_28 = arith.constant 0 : index
      %39 = vector.load %arg3[%c0_26, %c0_27, %c0_28] : memref<1x4x128xf32, #tpu.memory_space<vmem>>, vector<1x4x128xf32>
      %40 = vector.shape_cast %39 : vector<1x4x128xf32> to vector<4x128xf32>
      %c0_29 = arith.constant 0 : index
      %c0_30 = arith.constant 0 : index
      %41 = vector.load %arg5[%c0_29, %c0_30] : memref<8x4xf32, #tpu.memory_space<vmem>>, vector<8x4xf32>
      %cst_31 = arith.constant dense<0.000000e+00> : vector<8x128xf32>
      %42 = tpu.matmul %41, %40, %cst_31 {dimension_numbers = #tpu.dot_dimension_numbers<[1], [0], [0], [1], [0, 0, 1, 1], [], []>} : vector<8x4xf32>, vector<4x128xf32>, vector<8x128xf32> -> vector<8x128xf32>
      %c0_32 = arith.constant 0 : index
      %c0_33 = arith.constant 0 : index
      %43 = vector.load %arg6[%c0_32, %c0_33] : memref<8x1xf32, #tpu.memory_space<vmem>>, vector<8x1xf32>
      %44 = vector.broadcast %43 : vector<8x1xf32> to vector<8x128xf32>
      %45 = arith.addf %42, %44 : vector<8x128xf32>
      %cst_34 = arith.constant 0.353553385 : f32
      %46 = vector.broadcast %cst_34 : f32 to vector<8x128xf32>
      %47 = arith.mulf %45, %46 : vector<8x128xf32>
      %c0_35 = arith.constant 0 : index
      %c0_36 = arith.constant 0 : index
      %48 = vector.load %arg12[%c0_35, %c0_36] : memref<8x128xf32, #tpu.memory_space<vmem>>, vector<8x128xf32>
      tpu.vector_store %arg12[%c0_35, %c0_36], %47 {strides = array<i32>} : memref<8x128xf32, #tpu.memory_space<vmem>>, vector<8x128xf32>,
      %cst_37 = arith.constant 0xFF800000 : f32
      %49 = vector.broadcast %cst_37 : f32 to vector<1x128xf32>
      %c0_38 = arith.constant 0 : index
      %c0_39 = arith.constant 0 : index
      %50 = vector.load %arg13[%c0_38, %c0_39] : memref<1x128xf32, #tpu.memory_space<vmem>>, vector<1x128xf32>
      tpu.vector_store %arg13[%c0_38, %c0_39], %49 {strides = array<i32>} : memref<1x128xf32, #tpu.memory_space<vmem>>, vector<1x128xf32>,
      %cst_40 = arith.constant 0.000000e+00 : f32
      %51 = vector.broadcast %cst_40 : f32 to vector<1x128xf32>
      %c0_41 = arith.constant 0 : index
      %c0_42 = arith.constant 0 : index
      %52 = vector.load %arg14[%c0_41, %c0_42] : memref<1x128xf32, #tpu.memory_space<vmem>>, vector<1x128xf32>
      tpu.vector_store %arg14[%c0_41, %c0_42], %51 {strides = array<i32>} : memref<1x128xf32, #tpu.memory_space<vmem>>, vector<1x128xf32>,
      %cst_43 = arith.constant 0.000000e+00 : f32
      %53 = vector.broadcast %cst_43 : f32 to vector<8x128xf32>
      %c0_44 = arith.constant 0 : index
      %c0_45 = arith.constant 0 : index
      %54 = vector.load %arg15[%c0_44, %c0_45] : memref<8x128xf32, #tpu.memory_space<vmem>>, vector<8x128xf32>
      tpu.vector_store %arg15[%c0_44, %c0_45], %53 {strides = array<i32>} : memref<8x128xf32, #tpu.memory_space<vmem>>, vector<8x128xf32>,
    } else {
    }
    %c0 = arith.constant 0 : index
    %c0_1 = arith.constant 0 : index
    %c0_2 = arith.constant 0 : index
    %3 = vector.load %arg4[%c0, %c0_1, %c0_2] : memref<1x4x128xf32, #tpu.memory_space<vmem>>, vector<1x4x128xf32>
    %4 = vector.shape_cast %3 : vector<1x4x128xf32> to vector<4x128xf32>
    %c0_3 = arith.constant 0 : index
    %c0_4 = arith.constant 0 : index
    %5 = vector.load %arg7[%c0_3, %c0_4] : memref<16x4xf32, #tpu.memory_space<vmem>>, vector<16x4xf32>
    %cst = arith.constant dense<0.000000e+00> : vector<16x128xf32>
    %6 = tpu.matmul %5, %4, %cst {dimension_numbers = #tpu.dot_dimension_numbers<[1], [0], [0], [1], [0, 0, 1, 1], [], []>} : vector<16x4xf32>, vector<4x128xf32>, vector<16x128xf32> -> vector<16x128xf32>
    %c0_5 = arith.constant 0 : index
    %c0_6 = arith.constant 0 : index
    %7 = vector.load %arg8[%c0_5, %c0_6] : memref<16x1xf32, #tpu.memory_space<vmem>>, vector<16x1xf32>
    %8 = vector.broadcast %7 : vector<16x1xf32> to vector<16x128xf32>
    %9 = arith.addf %6, %8 : vector<16x128xf32>
    %10 = vector.extract_strided_slice %9 {offsets = [0, 0], sizes = [8, 128], strides = [1, 1]} : vector<16x128xf32> to vector<8x128xf32>
    %11 = vector.extract_strided_slice %9 {offsets = [8, 0], sizes = [8, 128], strides = [1, 1]} : vector<16x128xf32> to vector<8x128xf32>
    %c0_7 = arith.constant 0 : index
    %c0_8 = arith.constant 0 : index
    %12 = vector.load %arg12[%c0_7, %c0_8] : memref<8x128xf32, #tpu.memory_space<vmem>>, vector<8x128xf32>
    %cst_9 = arith.constant dense<0.000000e+00> : vector<128x128xf32>
    %13 = tpu.matmul %10, %12, %cst_9 {dimension_numbers = #tpu.dot_dimension_numbers<[0], [0], [1], [1], [0, 1, 1, 1], [], []>} : vector<8x128xf32>, vector<8x128xf32>, vector<128x128xf32> -> vector<128x128xf32>
    %c0_10 = arith.constant 0 : index
    %c0_11 = arith.constant 0 : index
    %14 = vector.load %arg13[%c0_10, %c0_11] : memref<1x128xf32, #tpu.memory_space<vmem>>, vector<1x128xf32>
    %cst_12 = arith.constant dense<0xFF800000> : vector<128xf32>
    %15 = vector.multi_reduction <maximumf>, %13, %cst_12 [0] : vector<128x128xf32> to vector<128xf32>
    %16 = vector.shape_cast %15 : vector<128xf32> to vector<1x128xf32>
    %17 = arith.maximumf %14, %16 : vector<1x128xf32>
    %18 = arith.subf %14, %17 : vector<1x128xf32>
    %19 = math.exp %18 : vector<1x128xf32>
    %20 = vector.broadcast %17 : vector<1x128xf32> to vector<128x128xf32>
    %21 = arith.subf %13, %20 : vector<128x128xf32>
    %22 = math.exp %21 : vector<128x128xf32>
    %c0_13 = arith.constant 0 : index
    %c0_14 = arith.constant 0 : index
    %23 = vector.load %arg14[%c0_13, %c0_14] : memref<1x128xf32, #tpu.memory_space<vmem>>, vector<1x128xf32>
    %24 = arith.mulf %19, %23 : vector<1x128xf32>
    %cst_15 = arith.constant dense<0.000000e+00> : vector<128xf32>
    %25 = vector.multi_reduction <add>, %22, %cst_15 [0] : vector<128x128xf32> to vector<128xf32>
    %26 = vector.shape_cast %25 : vector<128xf32> to vector<1x128xf32>
    %27 = arith.addf %24, %26 : vector<1x128xf32>
    %c0_16 = arith.constant 0 : index
    %c0_17 = arith.constant 0 : index
    %28 = vector.load %arg14[%c0_16, %c0_17] : memref<1x128xf32, #tpu.memory_space<vmem>>, vector<1x128xf32>
    tpu.vector_store %arg14[%c0_16, %c0_17], %27 {strides = array<i32>} : memref<1x128xf32, #tpu.memory_space<vmem>>, vector<1x128xf32>,
    %cst_18 = arith.constant dense<0.000000e+00> : vector<8x128xf32>
    %29 = tpu.matmul %11, %22, %cst_18 {dimension_numbers = #tpu.dot_dimension_numbers<[1], [0], [0], [1], [0, 0, 1, 1], [], []>} : vector<8x128xf32>, vector<128x128xf32>, vector<8x128xf32> -> vector<8x128xf32>
    %c0_19 = arith.constant 0 : index
    %c0_20 = arith.constant 0 : index
    %30 = vector.load %arg15[%c0_19, %c0_20] : memref<8x128xf32, #tpu.memory_space<vmem>>, vector<8x128xf32>
    %31 = vector.broadcast %19 : vector<1x128xf32> to vector<8x128xf32>
    %32 = arith.mulf %31, %30 : vector<8x128xf32>
    %33 = arith.addf %32, %29 : vector<8x128xf32>
    %c0_21 = arith.constant 0 : index
    %c0_22 = arith.constant 0 : index
    %34 = vector.load %arg15[%c0_21, %c0_22] : memref<8x128xf32, #tpu.memory_space<vmem>>, vector<8x128xf32>
    tpu.vector_store %arg15[%c0_21, %c0_22], %33 {strides = array<i32>} : memref<8x128xf32, #tpu.memory_space<vmem>>, vector<8x128xf32>,
    %c0_23 = arith.constant 0 : index
    %c0_24 = arith.constant 0 : index
    %35 = vector.load %arg13[%c0_23, %c0_24] : memref<1x128xf32, #tpu.memory_space<vmem>>, vector<1x128xf32>
    tpu.vector_store %arg13[%c0_23, %c0_24], %17 {strides = array<i32>} : memref<1x128xf32, #tpu.memory_space<vmem>>, vector<1x128xf32>,
    %c1_i32 = arith.constant 1 : i32
    %36 = arith.cmpi eq, %arg2, %c1_i32 : i32
    %37 = arith.extui %36 : i1 to i32
    %c0_i32_25 = arith.constant 0 : i32
    %38 = arith.cmpi ne, %37, %c0_i32_25 : i32
    scf.if %38 {
      %c0_26 = arith.constant 0 : index
      %c0_27 = arith.constant 0 : index
      %39 = vector.load %arg15[%c0_26, %c0_27] : memref<8x128xf32, #tpu.memory_space<vmem>>, vector<8x128xf32>
      %c0_28 = arith.constant 0 : index
      %c0_29 = arith.constant 0 : index
      %40 = vector.load %arg14[%c0_28, %c0_29] : memref<1x128xf32, #tpu.memory_space<vmem>>, vector<1x128xf32>
      %41 = tpu.reciprocal %40 {approx = true} : vector<1x128xf32> -> vector<1x128xf32>
      %42 = vector.broadcast %41 : vector<1x128xf32> to vector<8x128xf32>
      %43 = arith.mulf %39, %42 : vector<8x128xf32>
      %c0_30 = arith.constant 0 : index
      %c0_31 = arith.constant 0 : index
      %44 = vector.load %arg9[%c0_30, %c0_31] : memref<4x8xf32, #tpu.memory_space<vmem>>, vector<4x8xf32>
      %cst_32 = arith.constant dense<0.000000e+00> : vector<4x128xf32>
      %45 = tpu.matmul %44, %43, %cst_32 {dimension_numbers = #tpu.dot_dimension_numbers<[1], [0], [0], [1], [0, 0, 1, 1], [], []>} : vector<4x8xf32>, vector<8x128xf32>, vector<4x128xf32> -> vector<4x128xf32>
      %c0_33 = arith.constant 0 : index
      %c0_34 = arith.constant 0 : index
      %46 = vector.load %arg10[%c0_33, %c0_34] : memref<4x1xf32, #tpu.memory_space<vmem>>, vector<4x1xf32>
      %47 = vector.broadcast %46 : vector<4x1xf32> to vector<4x128xf32>
      %48 = arith.addf %45, %47 : vector<4x128xf32>
      %cst_35 = arith.constant 0.000000e+00 : f32
      %49 = vector.broadcast %cst_35 : f32 to vector<4x128xf32>
      %50 = arith.cmpf oge, %48, %49 : vector<4x128xf32>
      %cst_36 = arith.constant 2.000000e-01 : f32
      %51 = vector.broadcast %cst_36 : f32 to vector<4x128xf32>
      %52 = arith.mulf %51, %48 : vector<4x128xf32>
      %53 = arith.select %50, %48, %52 : vector<4x128xi1>, vector<4x128xf32>
      %c0_37 = arith.constant 0 : index
      %c0_38 = arith.constant 0 : index
      %c0_39 = arith.constant 0 : index
      %54 = vector.load %arg3[%c0_37, %c0_38, %c0_39] : memref<1x4x128xf32, #tpu.memory_space<vmem>>, vector<1x4x128xf32>
      %55 = vector.shape_cast %54 : vector<1x4x128xf32> to vector<4x128xf32>
      %56 = arith.addf %55, %53 : vector<4x128xf32>
      %c0_40 = arith.constant 0 : index
      %c0_41 = arith.constant 0 : index
      %c0_42 = arith.constant 0 : index
      %57 = vector.load %arg11[%c0_40, %c0_41, %c0_42] : memref<1x4x128xf32, #tpu.memory_space<vmem>>, vector<1x4x128xf32>
      %58 = vector.shape_cast %57 : vector<1x4x128xf32> to vector<4x128xf32>
      %59 = vector.shape_cast %56 : vector<4x128xf32> to vector<1x4x128xf32>
      tpu.vector_store %arg11[%c0_40, %c0_41, %c0_42], %59 {strides = array<i32>} : memref<1x4x128xf32, #tpu.memory_space<vmem>>, vector<1x4x128xf32>,
    } else {
    }
    return
  }
  func.func @transform_0(%arg0: i32, %arg1: i32, %arg2: i32) -> (i32, i32, i32) {
    %c0_i32 = arith.constant 0 : i32
    %c0_i32_0 = arith.constant 0 : i32
    return %arg0, %c0_i32, %arg1 : i32, i32, i32
  }
  func.func @transform_1(%arg0: i32, %arg1: i32, %arg2: i32) -> (i32, i32, i32) {
    %c0_i32 = arith.constant 0 : i32
    %c0_i32_0 = arith.constant 0 : i32
    return %arg0, %c0_i32, %arg2 : i32, i32, i32
  }
  func.func @transform_2(%arg0: i32, %arg1: i32, %arg2: i32) -> (i32, i32) {
    %c0_i32 = arith.constant 0 : i32
    %c0_i32_0 = arith.constant 0 : i32
    %c0_i32_1 = arith.constant 0 : i32
    return %c0_i32, %c0_i32_0 : i32, i32
  }
  func.func @transform_3(%arg0: i32, %arg1: i32, %arg2: i32) -> (i32, i32) {
    %c0_i32 = arith.constant 0 : i32
    %c0_i32_0 = arith.constant 0 : i32
    %c0_i32_1 = arith.constant 0 : i32
    return %c0_i32, %c0_i32_0 : i32, i32
  }
  func.func @transform_4(%arg0: i32, %arg1: i32, %arg2: i32) -> (i32, i32) {
    %c0_i32 = arith.constant 0 : i32
    %c0_i32_0 = arith.constant 0 : i32
    %c0_i32_1 = arith.constant 0 : i32
    return %c0_i32, %c0_i32_0 : i32, i32
  }
  func.func @transform_5(%arg0: i32, %arg1: i32, %arg2: i32) -> (i32, i32) {
    %c0_i32 = arith.constant 0 : i32
    %c0_i32_0 = arith.constant 0 : i32
    %c0_i32_1 = arith.constant 0 : i32
    return %c0_i32, %c0_i32_0 : i32, i32
  }
  func.func @transform_6(%arg0: i32, %arg1: i32, %arg2: i32) -> (i32, i32) {
    %c0_i32 = arith.constant 0 : i32
    %c0_i32_0 = arith.constant 0 : i32
    %c0_i32_1 = arith.constant 0 : i32
    return %c0_i32, %c0_i32_0 : i32, i32
  }
  func.func @transform_7(%arg0: i32, %arg1: i32, %arg2: i32) -> (i32, i32) {
    %c0_i32 = arith.constant 0 : i32
    %c0_i32_0 = arith.constant 0 : i32
    %c0_i32_1 = arith.constant 0 : i32
    return %c0_i32, %c0_i32_0 : i32, i32
  }
  func.func @transform_8(%arg0: i32, %arg1: i32, %arg2: i32) -> (i32, i32, i32) {
    %c0_i32 = arith.constant 0 : i32
    %c0_i32_0 = arith.constant 0 : i32
    return %arg0, %c0_i32, %arg1 : i32, i32, i32
  }
}

</mosaic_0001>

<bundles_post_ra>
// kernel: tpu_custom_call.1
= control target key start
LH: loop header
LB: loop body
LE: loop exit
PB: predicated region body
PF: predicated region fallthrough
CT: control target
= control target key end

     0   :  { %13 = vsyncpa [#allocation7], 0  ;;  %s1932_s0 = inlined_call_operand.vmem [shape: f32[2,4,256], index: 0, kind: input, shape index: {}]   ;;  %s1933_s1 = inlined_call_operand.vmem [shape: f32[2,4,256], index: 1, kind: input, shape index: {}]   ;;  %s1934_s2 = inlined_call_operand.vmem [shape: f32[8,4], index: 2, kind: input, shape index: {}]   ;;  %s1935_s3 = inlined_call_operand.vmem [shape: f32[8,1], index: 3, kind: input, shape index: {}]   ;;  %s1936_s4 = inlined_call_operand.vmem [shape: f32[16,4], index: 4, kind: input, shape index: {}]   ;;  %s1937_s5 = inlined_call_operand.vmem [shape: f32[16,1], index: 5, kind: input, shape index: {}]   ;;  %s1938_s6 = inlined_call_operand.vmem [shape: f32[4,8], index: 6, kind: input, shape index: {}]   ;;  %s1939_s7 = inlined_call_operand.vmem [shape: f32[4,1], index: 7, kind: input, shape index: {}]   ;;  %s1940_s8 = inlined_call_operand.hbm [shape: f32[2,4,256], index: 8, kind: output, shape index: {}]  }
   0x1   :  { %15 = vsyncpa [#allocation7 + $0x1], 0  ;;  %s1653_s27 = smov 0   ;;  %s1655_s28 = smov 0  }
   0x2   :  { %s1657_s29 = smov 0   ;;  %s1659_s30 = smov 0  }
   0x3   :  { %s1661_s9 = smov 0   ;;  %s1663_s10 = smov 0  }
   0x4   :  { %s1665_s11 = smov 0   ;;  %s1667_s12 = smov 0  }
   0x5   :  { %s1669_s13 = smov 0   ;;  %s1671_s14 = smov 0  }
   0x6 LB: > { %1950 = sst [smem:[#allocation9_spill]] %s1559_s27  ;;  %s1194_s15 = sadd.s32 4294967295, %s1595_s14   ;;  %s1595_s14 = sphi %s1671_s14, %s21_s14   ;;  %s1591_s13 = sphi %s1669_s13, %s1972_s13   ;;  %s1587_s12 = sphi %s1667_s12, %s1971_s12   ;;  %s1583_s11 = sphi %s1665_s11, %s1970_s11   ;;  %s1579_s10 = sphi %s1663_s10, %s1969_s10   ;;  %s1575_s9 = sphi %s1661_s9, %s1968_s9   ;;  %s1571_s30 = sphi %s1659_s30, %s1967_s30   ;;  %s1567_s29 = sphi %s1657_s29, %s1966_s29   ;;  %s1563_s28 = sphi %s1655_s28, %s1974_s28   ;;  %s1559_s27 = sphi %s1653_s27, %s1973_s27  }
   0x7   : > { %1951 = sst [smem:[#allocation10_spill]] %s1567_s29  ;;  %s1195_s16 = sadd.s32 4294967294, %s1595_s14  }
   0x8   : > { %1952 = sst [smem:[#allocation11_spill]] %s1583_s11  ;;  %s33_s17 = sadd.s32 1, %s1583_s11 }
   0x9   : > { %1953 = sst [smem:[#allocation12_spill]] %s1587_s12  ;;  %p34_p0 = scmp.ge.s32.totalorder %s33_s17, 2 }
   0xa   : > { %1954 = sst [smem:[#allocation13_spill]] %s1591_s13  ;;  %s36_s18 = sadd.s32 1, %s1587_s12 }
   0xb   : > { %s40_s19 = sadd.s32 1, %s1591_s13  ;;  %p241_p1 = scmp.ne.s32.totalorder %s1567_s29, %s1563_s28 }
   0xc   : > { %s1976_s17 = smov (%p34_p0, %s33_s17), 0  ;;  %s1978_s18 = smov (!%p34_p0, %s36_s18), %s1587_s12 }
   0xd   : > { %1955 = sst [smem:[#allocation14_spill]] %s1976_s17  ;;  %p242_p2 = scmp.eq.s32.totalorder %s1194_s15, 7 }
   0xe   : > { %p247_p3 = scmp.ne.s32.totalorder %s1563_s28, %s1559_s27  ;;  %p38_p4 = scmp.ge.s32.totalorder %s1978_s18, 2 }
   0xf   : > { %p248_p5 = scmp.eq.s32.totalorder %s1195_s16, 7  ;;  %p1715_p6 = por %p242_p2, %p241_p1 }
  0x10   : > { %s1980_s18 = smov (%p38_p4, %s1978_s18), 0  ;;  %s1982_s19 = smov (!%p38_p4, %s40_s19), %s1591_s13 }
  0x11   : > { %1957 = sst [smem:[#allocation15_spill]] %s1980_s18  ;;  %p1722_p7 = por %p248_p5, %p247_p3 }
  0x12   : > { %p1198_p8 = scmp.ge.s32.totalorder %s1595_s14, 1  ;;  %p42_p9 = scmp.ge.s32.totalorder %s1982_s19, 2 }
  0x13   : > { %s1958_s21 = scalar_select %p1722_p7, 1, 0 }
  0x14   : > { %p306_p10 = scmp.lt.s32.totalorder %s1595_s14, 9  ;;  %s227_s22 = ssub.s32 %s1587_s12, %s1980_s18 }
  0x15   : > { %1959 = sst [smem:[#allocation16_spill]] %s1958_s21  ;;  %s1984_s19 = smov (%p42_p9, %s1982_s19), 0 }
  0x16   : > { %1960 = sst [smem:[#allocation17_spill]] %s1984_s19  ;;  %p307_p11 = pnand %p1198_p8, %p306_p10 }
  0x17   : > { %s226_s23 = ssub.s32 %s1591_s13, %s1984_s19  ;;  %s231_s25 = sadd.s32 1, %s1567_s29 }
  0x18   : > { %s228_s24 = sor.u32 %s227_s22, %s226_s23  ;;  %s1948_s15 = sand.u32 (!%p307_p11), 1, %s1563_s28  }
  0x19   : > { %p229_p12 = scmp.eq.s32.totalorder %s228_s24, 0  ;;  %310 = sbr.rel (%p307_p11) target bundleno = 1345 (0x541), region = 52 }
  0x1a   : > { %p351_p13 = scmp.lt.s32.totalorder (!%p307_p11), %s1579_s10, 1  ;;  %s1742_s16 = sshll.u32 (!%p307_p11), %s1948_s15, 2 }
  0x1b   : > { %s1736_s26 = scalar_select %p229_p12, %s1567_s29, %s231_s25  }
  0x1c   : > { %p353_p0 = scmp.lt.s32.totalorder (!%p307_p11), %s1575_s9, 1  ;;  %p361_p1 = scmp.lt.s32.totalorder (!%p307_p11), %s1571_s30, 1 }
  0x1d   : > { %1961 = sst [smem:[#allocation18_spill]] %s1736_s26  ;;  %s350_s27 = scalar_lea.vmem (!%p307_p11), [#allocation6], %s1742_s16 }
  0x1e   : > { %s352_s22 = scalar_select %p351_p13, %s1579_s10, 1 }
  0x1f   : > { %s354_s23 = scalar_select %p353_p0, %s1575_s9, 1 }
  0x20   : > { %s1200_s24 = sshll.u32 %s352_s22, 1  ;;  %p1204_p2 = scmp.ne.s32.totalorder %s1571_s30, 0 }
  0x21   : > { %s356_s25 = sadd.s32 %s1200_s24, %s354_s23 }
  0x22   : > { %s1201_s19 = sshll.u32 %s356_s25, 2 }
  0x23   : > { %s1751_s13 = scalar_lea.vmem %s1932_s0, %s1201_s19 }
  0x24   : > { %s362_s12 = scalar_select %p361_p1, %s1571_s30, 1 }
  0x25   : > { %370 = sbr.rel (%p1204_p2) target bundleno = 243 (0xf3), region = 56 }
  0x26   : > { %s364_s11 = sadd.s32 %s1200_s24, %s362_s12 }
  0x27   : > { %s1203_s26 = sshll.u32 %s364_s11, 2 }
  0x28   : > { %s366_s15 = scalar_lea.vmem %s1933_s1, %s1203_s26 }
  0x2a   : > { %v371_v0 = vld [vmem:[%s1751_s13] sm:$0xf]  ;;  %vm383_vm0 = vcmask 1043456   ;;  %v1597_v2 = vmov 0.0   ;;  %vm1598_vm1 = vmmov 0   ;;  %vm379_vm2 = vcmask 31744  }
  0x2b   : > { %v372_v1 = vld [vmem:[%s1934_s2] sm:$0xff]  ;;  %1274 = vmatprep.subr.mxu0 %v1597_v2  ;;  %460 = vst [vmem:[#allocation4] sm:$0x1] %v1597_v2  ;;  %461 = vst [vmem:[#allocation5] sm:$0xff] %v1597_v2  ;;  %1276 = vmatprep.mubr.msk.f32.mxu0 %vm1598_vm1, %v1597_v2  ;;  %v1599_v4 = vmov 0   ;;  %v1600_v5 = vmov -inf  }
  0x2c   : > { %v373_v3 = vld [vmem:[%s1935_s3] sm:$0xff]  ;;  %1275 = vmatpush3.msk.msra.mxu0 %vm383_vm0, %v371_v0  ;;  %1447 = vset.pattern.permute.xlu0 %v1599_v4  ;;  %459 = vst [vmem:[#allocation3] sm:$0x1] %v1600_v5 }
  0x2d   : > { %1277 = vmatmul.mubr.msk.f32.vlgmr.msra.gmra.mxu0 %vm379_vm2, %v372_v1  ;;  %376 = vperm.xlu0 %1447, %v373_v3  }
  0xa8   : > { %v377_v6 = vpop.permute.xlu0 %376 }
  0xed   : > { %v453_v7 = vpop.f32.mrf.mxu0 }
  0xee   : > { %v454_v8 = vadd.f32 %v453_v7, %v377_v6 }
  0xef   : > { %v1278_v9 = vpop.f32.mrf.mxu0 }
  0xf0   : > { %v457_v10 = vmul.f32 0.35355338, %v454_v8 }
  0xf2   : > { %458 = vst [vmem:[#allocation2] sm:$0xff] %v457_v10 }
  0xf3 PF: > { %v462_v11 = vld [vmem:[%s366_s15] sm:$0xf]  ;;  %vm484_vm3 = vcmask 1043456   ;;  %vm477_vm4 = vcmask 31744   ;;  %v464_v13 = vld [vmem:[%s1936_s4 + $0x8] sm:$0xff]  ;;  %v1601_v15 = vmov 0   ;;  %v817_v8 = vlaneseq }
  0xf4   : > { %v463_v12 = vld [vmem:[%s1936_s4] sm:$0xff]  ;;  %1279 = vmatprep.subr.msk.mxu0 %vm484_vm3, %v462_v11  ;;  %v466_v14 = vld [vmem:[%s1937_s5 + $0x8] sm:$0xff]  ;;  %1449 = vset.pattern.permute.xlu1 %v1601_v15  ;;  %vm596_vm5 = vcmask 64512   ;;  %v1602_v38 = vmov 0.0   ;;  %vm1603_vm6 = vmmov 0   ;;  %p1226_p3 = scmp.ne.s32.totalorder %s1571_s30, 1 }
  0xf5   : > { %1281 = vmatprep.mubr.msk.f32.mxu0 %vm477_vm4, %v463_v12  ;;  %1280 = vmatpush3.msk.msra.mxu0 %vm484_vm3, %v462_v11  ;;  %v465_v16 = vld [vmem:[%s1937_s5] sm:$0xff]  ;;  %v818_v11 = vshrl.u32 %v817_v8, 7 }
  0xf6   : > { %1282 = vmatmul.mubr.msk.f32.vlgmr.msra.gmra.mxu0 %vm477_vm4, %v464_v13  ;;  %474 = vperm.xlu1 %1449, %v466_v14   ;;  %v790_v13 = vld [vmem:[#allocation3] sm:$0x1] }
  0xf7   : > { %1448 = vset.pattern.permute.xlu0 %v1601_v15  ;;  %1310 = vmatprep.subr.mxu0 %v1602_v38  ;;  %v1819_v15 = vsub.s32 0, %v818_v11 }
  0xf8   : > { %469 = vperm.xlu0 %1448, %v465_v16   ;;  %1342 = vmatprep.mubr.msk.f32.mxu0 %vm1603_vm6, %v1602_v38 }
  0xf9   : > { %v563_v20 = vld [vmem:[#allocation2] sm:$0xff] }
  0xfa   : > { %1284 = vmatprep.subr.mxu1 %v563_v20 }
  0xfb   : > { %1285 = vmatpush3.msra.mxu1 %v563_v20 }
 0x173   : > { %v470_v18 = vpop.permute.xlu0 %469 }
 0x1b6   : > { %v1778_v17 = vpop.f32.mrf.mxu0 }
 0x1b8   : > { %v554_v19 = vpop.f32.mrf.mxu0 }
 0x1b9   : > { %v555_v21 = vadd.f32 %v554_v19, %v470_v18 }
 0x1bb   : > { %564 = vxpose.xlu0.b32.start.end [1/1] (short) %v555_v21, 128 }
 0x237   : > { %v580_v22 = vpop.trf.xlu0 }
 0x238   : > { %1286 = vmatprep.mubr.msk.f32.mxu1 %vm596_vm5, %v580_v22 }
 0x23b   : > { %v581_v23 = vpop.trf.xlu0 }
 0x23c   : > { %1287 = vmatmul.mubr.msk.f32.vlgmr.msra.gmra.mxu1 %vm596_vm5, %v581_v23 }
 0x23f   : > { %v582_v24 = vpop.trf.xlu0 }
 0x240   : > { %1289 = vmatprep.mubr.msk.f32.mxu1 %vm596_vm5, %v582_v24 }
 0x243   : > { %v583_v25 = vpop.trf.xlu0 }
 0x244   : > { %1290 = vmatmul.mubr.msk.f32.gmra.mxu1 %vm596_vm5, %v583_v25 }
 0x247   : > { %v584_v26 = vpop.trf.xlu0 }
 0x248   : > { %1292 = vmatprep.mubr.msk.f32.mxu1 %vm596_vm5, %v584_v26 }
 0x24b   : > { %v585_v27 = vpop.trf.xlu0 }
 0x24c   : > { %1293 = vmatmul.mubr.msk.f32.gmra.mxu1 %vm596_vm5, %v585_v27 }
 0x24f   : > { %v586_v28 = vpop.trf.xlu0 }
 0x250   : > { %1295 = vmatprep.mubr.msk.f32.mxu1 %vm596_vm5, %v586_v28 }
 0x253   : > { %v587_v29 = vpop.trf.xlu0 }
 0x254   : > { %1296 = vmatmul.mubr.msk.f32.gmra.mxu1 %vm596_vm5, %v587_v29 }
 0x257   : > { %v588_v30 = vpop.trf.xlu0 }
 0x258   : > { %1298 = vmatprep.mubr.msk.f32.mxu1 %vm596_vm5, %v588_v30 }
 0x25b   : > { %v589_v31 = vpop.trf.xlu0 }
 0x25c   : > { %1299 = vmatmul.mubr.msk.f32.gmra.mxu1 %vm596_vm5, %v589_v31 }
 0x25f   : > { %v590_v32 = vpop.trf.xlu0 }
 0x260   : > { %1301 = vmatprep.mubr.msk.f32.mxu1 %vm596_vm5, %v590_v32 }
 0x263   : > { %v591_v33 = vpop.trf.xlu0 }
 0x264   : > { %1302 = vmatmul.mubr.msk.f32.gmra.mxu1 %vm596_vm5, %v591_v33 }
 0x267   : > { %v592_v34 = vpop.trf.xlu0 }
 0x268   : > { %1304 = vmatprep.mubr.msk.f32.mxu1 %vm596_vm5, %v592_v34 }
 0x26b   : > { %v593_v35 = vpop.trf.xlu0 }
 0x26c   : > { %1305 = vmatmul.mubr.msk.f32.gmra.mxu1 %vm596_vm5, %v593_v35 }
 0x26f   : > { %v594_v36 = vpop.trf.xlu0 }
 0x270   : > { %1307 = vmatprep.mubr.msk.f32.mxu1 %vm596_vm5, %v594_v36 }
 0x273   : > { %v595_v37 = vpop.trf.xlu0 }
 0x274   : > { %1308 = vmatmul.mubr.msk.f32.gmra.mxu1 %vm596_vm5, %v595_v37 }
 0x2fc   : > { %v1288_v39 = vpop.f32.mrf.mxu1 }
 0x2fe   : > { %v711_v40 = vpop.f32.mrf.mxu1 }
 0x304   : > { %v1291_v41 = vpop.f32.mrf.mxu1 }
 0x306   : > { %v721_v42 = vpop.f32.mrf.mxu1 }
 0x30c   : > { %v1294_v43 = vpop.f32.mrf.mxu1 }
 0x30d   : > { %v792_v54 = vmax.f32 %v1288_v39, %v1294_v43 }
 0x30e   : > { %v731_v44 = vpop.f32.mrf.mxu1 }
 0x30f   : > { %v791_v52 = vmax.f32 %v711_v40, %v731_v44 }
 0x314   : > { %v1798_v45 = vpop.f32.mrf.mxu1 }
 0x315   : > { %v794_v55 = vmax.f32 %v1291_v41, %v1798_v45 }
 0x316   : > { %v741_v46 = vpop.f32.mrf.mxu1 }
 0x317   : > { %v793_v56 = vmax.f32 %v721_v42, %v741_v46 }
 0x31c   : > { %v1800_v47 = vpop.f32.mrf.mxu1 }
 0x31d   : > { %v796_v59 = vmax.f32 %v792_v54, %v1800_v47 }
 0x31e   : > { %v1802_v48 = vpop.f32.mrf.mxu1 }
 0x31f   : > { %v795_v57 = vmax.f32 %v791_v52, %v1802_v48 }
 0x324   : > { %v1804_v49 = vpop.f32.mrf.mxu1 }
 0x325   : > { %v798_v60 = vmax.f32 %v794_v55, %v1804_v49 }
 0x326   : > { %v1806_v50 = vpop.f32.mrf.mxu1 }
 0x327   : > { %v797_v61 = vmax.f32 %v793_v56, %v1806_v50 }
 0x32c   : > { %v1808_v51 = vpop.f32.mrf.mxu1 }
 0x32d   : > { %v800_v0 = vmax.f32 %v796_v59, %v1808_v51 }
 0x32e   : > { %v1810_v53 = vpop.f32.mrf.mxu1 }
 0x32f   : > { %v799_v62 = vmax.f32 %v795_v57, %v1810_v53 }
 0x331   : > { %v803_v3 = vmax.f32 %v799_v62, %v800_v0 }
 0x334   : > { %v1309_v58 = vpop.f32.mrf.mxu1 }
 0x335   : > { %v802_v1 = vmax.f32 %v798_v60, %v1309_v58 }
 0x336   : > { %v781_v63 = vpop.f32.mrf.mxu1 }
 0x337   : > { %v801_v2 = vmax.f32 %v797_v61, %v781_v63 }
 0x339   : > { %v804_v4 = vmax.f32 %v801_v2, %v802_v1 }
 0x33b   : > { %v805_v5 = vmax.f32 %v803_v3, %v804_v4 }
 0x33d   : > { %v806_v6 = vrot.slane %v805_v5, 4 }
 0x33f   : > { %v807_v7 = vmax.f32 %v805_v5, %v806_v6 }
 0x341   : > { %v808_v9 = vrot.slane %v807_v7, 2 }
 0x343   : > { %v809_v10 = vmax.f32 %v807_v7, %v808_v9 }
 0x345   : > { %v810_v12 = vrot.slane %v809_v10, 1 }
 0x347   : > { %v811_v14 = vmax.f32 %v809_v10, %v810_v12 }
 0x349   : > { %v812_v16 = vmax.f32 %v790_v13, %v811_v14 }
 0x34b   : > { %v813_v18 = vsub.f32 %v790_v13, %v812_v16  ;;  %v820_v19 = vrot.slane %v812_v16, %v1819_v15  ;;  %975 = vst [vmem:[#allocation3] sm:$0x1] %v812_v16 }
 0x34d   : > { %v814_v20 = vmul.f32 1.442695, %v813_v18  ;;  %v822_v21 = vsub.f32 %v711_v40, %v820_v19  ;;  %v823_v22 = vsub.f32 %v1288_v39, %v820_v19  ;;  %v824_v23 = vsub.f32 %v721_v42, %v820_v19 }
 0x34e   : > { %v825_v24 = vsub.f32 %v1291_v41, %v820_v19  ;;  %v826_v27 = vsub.f32 %v731_v44, %v820_v19  ;;  %v827_v29 = vsub.f32 %v1294_v43, %v820_v19  ;;  %v828_v31 = vsub.f32 %v741_v46, %v820_v19 }
 0x34f   : > { %1450 = vpow2.f32 %v814_v20  ;;  %v838_v25 = vmul.f32 1.442695, %v822_v21  ;;  %v840_v26 = vmul.f32 1.442695, %v823_v22  ;;  %v842_v28 = vmul.f32 1.442695, %v824_v23 }
 0x350   : > { %v844_v30 = vmul.f32 1.442695, %v825_v24  ;;  %v846_v32 = vmul.f32 1.442695, %v826_v27  ;;  %v829_v33 = vsub.f32 %v1798_v45, %v820_v19  ;;  %v848_v34 = vmul.f32 1.442695, %v827_v29 }
 0x351   : > { %1452 = vpow2.f32 %v838_v25  ;;  %v830_v35 = vsub.f32 %v1802_v48, %v820_v19  ;;  %v837_v36 = vsub.f32 %v1309_v58, %v820_v19  ;;  %v850_v37 = vmul.f32 1.442695, %v828_v31  ;;  %v870_v29 = vld [vmem:[#allocation4] sm:$0x1]  ;;  %v475_v31 = vpop.permute.xlu1 %474 }
 0x352   : > { %1454 = vpow2.f32 %v840_v26  ;;  %v831_v39 = vsub.f32 %v1800_v47, %v820_v19  ;;  %v836_v41 = vsub.f32 %v781_v63, %v820_v19  ;;  %v852_v42 = vmul.f32 1.442695, %v829_v33 }
 0x353   : > { %1456 = vpow2.f32 %v842_v28  ;;  %v832_v43 = vsub.f32 %v1806_v50, %v820_v19  ;;  %v854_v44 = vmul.f32 1.442695, %v830_v35  ;;  %v835_v46 = vsub.f32 %v1808_v51, %v820_v19 }
 0x354   : > { %1458 = vpow2.f32 %v844_v30  ;;  %v868_v48 = vmul.f32 1.442695, %v837_v36  ;;  %v833_v52 = vsub.f32 %v1804_v49, %v820_v19  ;;  %v856_v54 = vmul.f32 1.442695, %v831_v39  ;;  %v965_v36 = vld [vmem:[#allocation5] sm:$0xff] }
 0x355   : > { %1460 = vpow2.f32 %v846_v32  ;;  %v834_v47 = vsub.f32 %v1810_v53, %v820_v19  ;;  %v866_v56 = vmul.f32 1.442695, %v836_v41  ;;  %v858_v50 = vmul.f32 1.442695, %v832_v43 }
 0x356   : > { %1462 = vpow2.f32 %v848_v34  ;;  %v864_v58 = vmul.f32 1.442695, %v835_v46  ;;  %v860_v49 = vmul.f32 1.442695, %v833_v52  ;;  %v560_v35 = vadd.f32 %v1778_v17, %v475_v31 }
 0x357   : > { %1464 = vpow2.f32 %v850_v37  ;;  %v862_v60 = vmul.f32 1.442695, %v834_v47 }
 0x358   : > { %1466 = vpow2.f32 %v852_v42 }
 0x359   : > { %1468 = vpow2.f32 %v854_v44 }
 0x35a   : > { %1470 = vpow2.f32 %v868_v48 }
 0x35b   : > { %1472 = vpow2.f32 %v856_v54 }
 0x35c   : > { %v1825_v40 = vpop.eup %1450  ;;  %1474 = vpow2.f32 %v866_v56 }
 0x35d   : > { %v970_v45 = vrot.slane %v1825_v40, %v1819_v15  ;;  %1476 = vpow2.f32 %v858_v50  ;;  %v871_v32 = vmul.f32 %v1825_v40, %v870_v29 }
 0x35e   : > { %v1832_v55 = vpop.eup %1452  ;;  %1478 = vpow2.f32 %v864_v58 }
 0x35f   : > { %v1835_v57 = vpop.eup %1454  ;;  %1480 = vpow2.f32 %v860_v49  ;;  %v972_v37 = vmul.f32 %v970_v45, %v965_v36 }
 0x360   : > { %v872_v51 = vadd.f32 %v1835_v57, %v1832_v55  ;;  %v1839_v59 = vpop.eup %1456  ;;  %1482 = vpow2.f32 %v862_v60 }
 0x361   : > { %v1459_v53 = vpop.eup %1458 }
 0x362   : > { %v873_v61 = vadd.f32 %v1839_v59, %v872_v51  ;;  %v1461_v63 = vpop.eup %1460 }
 0x363   : > { %v1463_v1 = vpop.eup %1462 }
 0x364   : > { %v874_v62 = vadd.f32 %v1459_v53, %v873_v61  ;;  %v1465_v3 = vpop.eup %1464 }
 0x365   : > { %v1467_v5 = vpop.eup %1466 }
 0x366   : > { %v875_v0 = vadd.f32 %v1461_v63, %v874_v62  ;;  %v1469_v6 = vpop.eup %1468 }
 0x367   : > { %v1471_v8 = vpop.eup %1470 }
 0x368   : > { %v876_v2 = vadd.f32 %v1463_v1, %v875_v0  ;;  %v1473_v9 = vpop.eup %1472  ;;  %1311 = vmatpush3.msra.mxu0 %v1471_v8 }
 0x369   : > { %v1475_v11 = vpop.eup %1474  ;;  %1312 = vmatprep.subr.mxu0 %v1602_v38 }
 0x36a   : > { %v877_v4 = vadd.f32 %v1465_v3, %v876_v2  ;;  %v1477_v12 = vpop.eup %1476  ;;  %1313 = vmatpush3.msra.mxu0 %v1475_v11 }
 0x36b   : > { %v1479_v14 = vpop.eup %1478  ;;  %1314 = vmatprep.subr.mxu0 %v1602_v38 }
 0x36c   : > { %v878_v7 = vadd.f32 %v1467_v5, %v877_v4  ;;  %v1481_v16 = vpop.eup %1480  ;;  %1315 = vmatpush3.msra.mxu0 %v1479_v14 }
 0x36d   : > { %v1483_v19 = vpop.eup %1482  ;;  %1316 = vmatprep.subr.mxu0 %v1602_v38 }
 0x36e   : > { %v879_v10 = vadd.f32 %v1469_v6, %v878_v7  ;;  %1317 = vmatpush3.msra.mxu0 %v1483_v19 }
 0x36f   : > { %1318 = vmatprep.subr.mxu0 %v1602_v38 }
 0x370   : > { %v880_v13 = vadd.f32 %v1473_v9, %v879_v10  ;;  %1319 = vmatpush3.msra.mxu0 %v1481_v16 }
 0x371   : > { %1320 = vmatprep.subr.mxu0 %v1602_v38 }
 0x372   : > { %v881_v18 = vadd.f32 %v1477_v12, %v880_v13  ;;  %1321 = vmatpush3.msra.mxu0 %v1477_v12 }
 0x373   : > { %1322 = vmatprep.subr.mxu0 %v1602_v38 }
 0x374   : > { %v882_v20 = vadd.f32 %v1481_v16, %v881_v18  ;;  %1323 = vmatpush3.msra.mxu0 %v1473_v9 }
 0x375   : > { %1324 = vmatprep.subr.mxu0 %v1602_v38 }
 0x376   : > { %v883_v21 = vadd.f32 %v1483_v19, %v882_v20  ;;  %1325 = vmatpush3.msra.mxu0 %v1469_v6 }
 0x377   : > { %1326 = vmatprep.subr.mxu0 %v1602_v38 }
 0x378   : > { %v884_v22 = vadd.f32 %v1479_v14, %v883_v21  ;;  %1327 = vmatpush3.msra.mxu0 %v1467_v5 }
 0x379   : > { %1328 = vmatprep.subr.mxu0 %v1602_v38 }
 0x37a   : > { %v885_v23 = vadd.f32 %v1475_v11, %v884_v22  ;;  %1329 = vmatpush3.msra.mxu0 %v1465_v3 }
 0x37b   : > { %1330 = vmatprep.subr.mxu0 %v1602_v38 }
 0x37c   : > { %v886_v24 = vadd.f32 %v1471_v8, %v885_v23  ;;  %1331 = vmatpush3.msra.mxu0 %v1463_v1 }
 0x37d   : > { %1332 = vmatprep.subr.mxu0 %v1602_v38 }
 0x37e   : > { %v887_v25 = vrot.slane %v886_v24, 4  ;;  %1333 = vmatpush3.msra.mxu0 %v1461_v63 }
 0x37f   : > { %1334 = vmatprep.subr.mxu0 %v1602_v38 }
 0x380   : > { %v888_v26 = vadd.f32 %v887_v25, %v886_v24  ;;  %1335 = vmatpush3.msra.mxu0 %v1459_v53 }
 0x381   : > { %1336 = vmatprep.subr.mxu0 %v1602_v38 }
 0x382   : > { %v889_v27 = vrot.slane %v888_v26, 2  ;;  %1337 = vmatpush3.msra.mxu0 %v1839_v59 }
 0x383   : > { %1338 = vmatprep.subr.mxu0 %v1602_v38 }
 0x384   : > { %v890_v28 = vadd.f32 %v889_v27, %v888_v26  ;;  %1339 = vmatpush3.msra.mxu0 %v1835_v57 }
 0x385   : > { %1340 = vmatprep.subr.mxu0 %v1602_v38 }
 0x386   : > { %v891_v30 = vrot.slane %v890_v28, 1  ;;  %1341 = vmatpush3.msra.mxu0 %v1832_v55 }
 0x387   : > { %1343 = vmatmul.mubr.f32.vlgmr.msra.gmra.mxu0 %v560_v35 }
 0x388   : > { %v892_v33 = vadd.f32 %v891_v30, %v890_v28 }
 0x38a   : > { %v893_v34 = vadd.f32 %v892_v33, %v871_v32 }
 0x38c   : > { %894 = vst [vmem:[#allocation4] sm:$0x1] %v893_v34 }
 0x446   : > { %979 = sbr.rel (%p1226_p3) target bundleno = 1320 (0x528), region = 60 }
 0x447   : > { %v961_v39 = vpop.f32.mrf.mxu0 }
 0x448   : > { %v973_v41 = vadd.f32 %v972_v37, %v961_v39 }
 0x449   : > { %v1344_v42 = vpop.f32.mrf.mxu0 }
 0x44a   : > { %974 = vst [vmem:[#allocation5] sm:$0xff] %v973_v41 }
 0x44b   : > { %v981_v43 = vld [vmem:[#allocation4] sm:$0x1]  ;;  %v1604_v17 = vmov 0.0   ;;  %vm1605_vm7 = vmmov 0   ;;  %v991_v38 = vld [vmem:[%s1939_s7] sm:$0xf] }
 0x44c   : > { %1345 = vmatprep.subr.mxu0 %v1604_v17  ;;  %1485 = vrcp.f32 %v981_v43  ;;  %1347 = vmatprep.mubr.msk.f32.mxu0 %vm1605_vm7, %v1604_v17  ;;  %v1606_v44 = vmov 0   ;;  %v990_v52 = vld [vmem:[%s1938_s6] sm:$0xf] }
 0x44d   : > { %1484 = vset.pattern.permute.xlu0 %v1606_v44  ;;  %v1073_v50 = vld [vmem:[%s1751_s13] sm:$0xf] }
 0x44e   : > { %994 = vperm.xlu0 %1484, %v991_v38  }
 0x451   : > { %v980_v45 = vld [vmem:[#allocation5] sm:$0xff] }
 0x459   : > { %v1486_v40 = vpop.eup %1485 }
 0x45a   : > { %v987_v46 = vrot.slane %v1486_v40, %v1819_v15 }
 0x45c   : > { %v989_v48 = vmul.f32 %v987_v46, %v980_v45 }
 0x45e   : > { %1346 = vmatpush3.msra.mxu0 %v989_v48 }
 0x45f   : > { %1348 = vmatmul.mubr.msk.f32.vlgmr.msra.gmra.mxu0 %vm596_vm5, %v990_v52 }
 0x4c9   : > { %v995_v54 = vpop.permute.xlu0 %994 }
 0x51f   : > { %v1066_v55 = vpop.f32.mrf.mxu0 }
 0x520   : > { %v1067_v47 = vadd.f32 %v1066_v55, %v995_v54 }
 0x521   : > { %v1349_v56 = vpop.f32.mrf.mxu0 }
 0x522   : > { %vm1070_vm8 = vcmp.ge.f32.partialorder %v1067_v47, 0.0  ;;  %v1071_v57 = vmul.f32 0.2, %v1067_v47 }
 0x524   : > { %v1072_v58 = vsel %vm1070_vm8, %v1067_v47, %v1071_v57 }
 0x525   : > { %v1074_v51 = vadd.f32 %v1073_v50, %v1072_v58 }
 0x527   : > { %1075 = vst [vmem:[%s350_s27] sm:$0xf] %v1074_v51 }
 0x528 PF: > { %s1229_s29 = sshll.u32 %s1579_s10, 1  ;;  %s1092_s12 = sshll.u32 %s350_s27, 4  ;;  %s1093_s12 = int_to_ptr.vmem [resolvable:$true] %s1092_s12 }
 0x529   : > { %s1088_s11 = sadd.s32 %s1575_s9, %s1229_s29  ;;  %s1962_s21 = sand.u32 1, %s1563_s28  }
 0x52a   : > { %s1230_s17 = sshll.u32 %s1088_s11, 6  ;;  %s1077_s26 = scalar_lea.sflag [#allocation7], %s1962_s21 }
 0x52b   : > { %s1090_s13 = scalar_lea.hbm %s1940_s8, %s1230_s17  ;;  %s1487_s15 = scalar_lea.vmem %s1093_s12, 64 }
 0x52c   : > { %p1488_p4 = scmp.ne.s32.totalorder %s1093_s12, %s1487_s15  ;;  %s1607_s24 = smov [#allocation6]  }
 0x52d   : > { %s1491_s25 = sshll.u32 %s1607_s24, 4  ;;  %s1492_s25 = int_to_ptr.vmem [resolvable:$false] %s1491_s25 }
 0x52e   : > { %p1489_p5 = pnand %p1488_p4, %p1715_p6  ;;  %s1493_s10 = scalar_lea.vmem %s1492_s25, 128 }
 0x52f   : > { %p1494_p9 = scmp.lt.s32.totalorder %s1093_s12, %s1492_s25  ;;  %p1495_p10 = scmp.lt.s32.totalorder %s1493_s10, %s1487_s15 }
 0x530   : > { %p1490_p8 = pneg %p1489_p5 }
 0x531   : > { %p1496_p11 = por %p1495_p10, %p1494_p9 }
 0x533   : > { %p1497_p12 = pnand %p1496_p11, %p1490_p8 }
 0x535   : > { %1500 = shalt.err (!%p1497_p12)
}
 0x536   : > { %s1501_s27 = scalar_lea.hbm %s1090_s13, 64  ;;  %s1505_s22 = scalar_lea.hbm %s1940_s8, 256 }
 0x537   : > { %p1502_p13 = scmp.ne.s32.totalorder %s1090_s13, %s1501_s27  ;;  %p1506_p2 = scmp.lt.s32.totalorder %s1090_s13, %s1940_s8 }
 0x538   : > { %p1507_p3 = scmp.lt.s32.totalorder %s1505_s22, %s1501_s27 }
 0x539   : > { %p1503_p0 = pnand %p1502_p13, %p1715_p6 }
 0x53a   : > { %p1508_p4 = por %p1507_p3, %p1506_p2 }
 0x53b   : > { %p1504_p1 = pneg %p1503_p0 }
 0x53d   : > { %p1509_p5 = pnand %p1508_p4, %p1504_p1 }
 0x53f   : > { %1512 = shalt.err (!%p1509_p5)
}
 0x540   : > { %1350 = dma.vmem_to_hbm [thread:$0]  (%p1715_p6), %s1093_s12, 64, %s1090_s13, %s1077_s26  }
 0x541 PF: > { %s1963_s29 = sld [smem:[#allocation9_spill]]  ;;  %p1356_p8 = scmp.ge.s32.totalorder %s1595_s14, 2 }
 0x543   : > { %p1353_p9 = pnand %p1356_p8, %p1722_p7 }
 0x545   : > { %p1354_p10 = pneg %p1353_p9 }
 0x547   : > { %s1104_s17 = sand.u32 1, %s1963_s29  }
 0x548   : > { %s1105_s18 = scalar_lea.sflag [#allocation7], %s1104_s17 }
 0x549   : > { %1554 = dma.done.wait (%p1354_p10), %s1105_s18, 64  }
 0x54a   : > { %1556 = vsyncadd (%p1354_p10), %s1105_s18, 4294967232  ;;  %s21_s14 = sadd.s32 1, %s1595_s14   ;;  %s1965_s19 = sld [smem:[#allocation10_spill]] }
 0x54b   : > { %p18_p11 = scmp.ge.s32.totalorder %s21_s14, 10   ;;  %s1966_s29 = sld [smem:[#allocation18_spill]] }
 0x54c   : > { %s1967_s30 = sld [smem:[#allocation11_spill]]  ;;  %s1973_s27 = smov %s1563_s28 }
 0x54d   : > { %s1968_s9 = sld [smem:[#allocation12_spill]]  ;;  %20 = sbr.rel (!%p18_p11) target bundleno = 6 (0x6), region = 98 }
 0x54e   : > { %s1969_s10 = sld [smem:[#allocation13_spill]] }
 0x54f   : > { %s1970_s11 = sld [smem:[#allocation14_spill]] }
 0x550   : > { %s1971_s12 = sld [smem:[#allocation15_spill]]  ;;  %s1974_s28 = smov %s1965_s19 }
 0x551   : > { %s1972_s13 = sld [smem:[#allocation17_spill]] }
 0x552   :  { %1110 = vsyncpa [#allocation7], 1 }
 0x553   :  { %1112 = vsyncpa [#allocation7 + $0x1], 1 }

</bundles_post_ra>
